<compile_context>
chip_gen: v6e
topology: v6e:2x2x1
jax: 0.10.0
libtpu: 0.0.40
codegen_flags: <defaults>
</compile_context>

<pallas_src>
import jax
import jax.numpy as jnp
from jax.experimental import pallas as pl
from jax.experimental.pallas import tpu as pltpu


def _scale_bias_kernel(x_ref, scale_ref, bias_ref, o_ref):
    # x_ref:     (ROW_TILE, L)
    # scale_ref: (1, L)  fp32, resident across the grid (constant index_map)
    # bias_ref:  (1, L)  fp32, resident across the grid
    x = x_ref[...].astype(jnp.float32)
    y = x * scale_ref[...] + bias_ref[...]   # (1, L) broadcasts over sublanes
    o_ref[...] = y.astype(o_ref.dtype)


def scale_bias_layer(x, scale, bias, *, target_block_bytes=4 << 20):
    """y = x * scale + bias, broadcasting (D,) params over (..., D) input."""
    orig_shape = x.shape
    D = orig_shape[-1]
    rows = x.size // D
    x2d = x.reshape(rows, D)

    scale_f = scale.astype(jnp.float32).reshape(-1)
    bias_f = bias.astype(jnp.float32).reshape(-1)

    # ---- Lane packing: keep the output last dim lane-dense (>=128) ----------
    # If D < 128, fold k consecutive rows into the lane axis and tile the
    # params k times; the affine is per-channel so this is exact.
    k = 1
    if D < 128:
        cand = 2
        while cand <= rows and D * cand <= 1024:
            if rows % cand == 0:
                k = cand
            cand *= 2
    L = D * k
    R = rows // k
    x2d = x2d.reshape(R, L)
    if k > 1:
        scale_f = jnp.tile(scale_f, k)
        bias_f = jnp.tile(bias_f, k)
    scale2d = scale_f.reshape(1, L)
    bias2d = bias_f.reshape(1, L)

    # ---- Row-tile selection from the VMEM budget ----------------------------
    itemsize = jnp.dtype(x.dtype).itemsize
    max_rows = max(8, target_block_bytes // (L * itemsize))
    row_tile = int(min(R, max_rows))
    if row_tile < R:
        row_tile = max(8, (row_tile // 8) * 8)       # (8,128) sublane rule
        R_pad = pl.cdiv(R, row_tile) * row_tile      # pad rows to tile multiple
        if R_pad != R:
            x2d = jnp.pad(x2d, ((0, R_pad - R), (0, 0)))
    else:
        row_tile = R                                 # whole array = one block
        R_pad = R

    grid = (R_pad // row_tile,)

    out2d = pl.pallas_call(
        _scale_bias_kernel,
        out_shape=jax.ShapeDtypeStruct((R_pad, L), x.dtype),
        grid_spec=pltpu.PrefetchScalarGridSpec(
            num_scalar_prefetch=0,
            grid=grid,
            in_specs=[
                pl.BlockSpec((row_tile, L), lambda i: (i, 0)),
                pl.BlockSpec((1, L), lambda i: (0, 0)),
                pl.BlockSpec((1, L), lambda i: (0, 0)),
            ],
            out_specs=pl.BlockSpec((row_tile, L), lambda i: (i, 0)),
        ),
        compiler_params=pltpu.CompilerParams(
            dimension_semantics=("parallel",),       # megacore-shard the rows
            vmem_limit_bytes=32 << 20,               # safe on v5e/v6e/v7x
        ),
    )(x2d, scale2d, bias2d)

    if R_pad != R:
        out2d = out2d[:R]
    return out2d.reshape(orig_shape)


class ScaleBiasLayerPallas:
    """Mirrors the PyTorch ScaleBiasLayer; params held as JAX arrays."""

    def __init__(self, d_model: int, adaptive_scale: bool, key=None):
        self.adaptive_scale = adaptive_scale
        # Module init is ones/zeros in both branches; for a meaningful test of
        # the adaptive path we deterministically perturb the "learned" params.
        if adaptive_scale:
            if key is None:
                key = jax.random.PRNGKey(0)
            k1, k2 = jax.random.split(key)
            self.scale = 1.0 + 0.1 * jax.random.normal(k1, (d_model,), jnp.float32)
            self.bias = 0.1 * jax.random.normal(k2, (d_model,), jnp.float32)
        else:
            self.scale = jnp.ones((d_model,), jnp.float32)
            self.bias = jnp.zeros((d_model,), jnp.float32)

    def __call__(self, x):
        return scale_bias_layer(x, self.scale, self.bias)


if __name__ == "__main__":
    key = jax.random.PRNGKey(0)
    kx, kp, kx2 = jax.random.split(key, 3)

    # --- Small shape matching the module convention: (B, T, d_model) --------
    B, T, D = 2, 8, 32
    x = jax.random.normal(kx, (B, T, D), jnp.float32)

    layer = ScaleBiasLayerPallas(d_model=D, adaptive_scale=True, key=kp)
    y = jax.block_until_ready(layer(x))
    y_ref = x * layer.scale.reshape(1, 1, -1) + layer.bias.reshape(1, 1, -1)
    assert jnp.allclose(y, y_ref, atol=1e-6, rtol=1e-6)

    # --- Non-adaptive path (identity) ----------------------------------------
    layer_id = ScaleBiasLayerPallas(d_model=D, adaptive_scale=False)
    y_id = jax.block_until_ready(layer_id(x))
    assert jnp.allclose(y_id, x, atol=1e-6, rtol=1e-6)

    # --- Exercise the multi-tile + row-padding path with a tiny block budget -
    B2, T2, D2 = 3, 40, 48  # rows=120 -> packed (15, 384), padded to 16 rows
    x2 = jax.random.normal(kx2, (B2, T2, D2), jnp.float32)
    layer2 = ScaleBiasLayerPallas(d_model=D2, adaptive_scale=True, key=kp)
    y2 = jax.block_until_ready(
        scale_bias_layer(x2, layer2.scale, layer2.bias, target_block_bytes=16 << 10)
    )
    y2_ref = x2 * layer2.scale.reshape(1, 1, -1) + layer2.bias.reshape(1, 1, -1)
    assert jnp.allclose(y2, y2_ref, atol=1e-6, rtol=1e-6)

    print("KERNEL_OK")
</pallas_src>

<mosaic_0001>
module attributes {stable_mosaic.version = 11 : i64} {
  func.func @_scale_bias_kernel(%arg0: i32, %arg1: memref<1x512xf32, #tpu.memory_space<vmem>>, %arg2: memref<1x512xf32, #tpu.memory_space<vmem>>, %arg3: memref<1x512xf32, #tpu.memory_space<vmem>>, %arg4: memref<1x512xf32, #tpu.memory_space<vmem>>) attributes {dimension_semantics = [#tpu.dimension_semantics<parallel>], iteration_bounds = array<i64: 1>, scalar_prefetch = 0 : i64, scratch_operands = 0 : i64, tpu.core_type = #tpu.core_type<tc>, window_params = [{transform_indices = @transform_0, window_bounds = array<i64: 1, 512>}, {pipeline_mode = #tpu.pipeline_mode<synchronous>, transform_indices = @transform_1, window_bounds = array<i64: 1, 512>}, {pipeline_mode = #tpu.pipeline_mode<synchronous>, transform_indices = @transform_2, window_bounds = array<i64: 1, 512>}, {transform_indices = @transform_3, window_bounds = array<i64: 1, 512>}]} {
    %c0 = arith.constant 0 : index
    %c0_0 = arith.constant 0 : index
    %0 = vector.load %arg1[%c0, %c0_0] : memref<1x512xf32, #tpu.memory_space<vmem>>, vector<1x512xf32>
    %c0_1 = arith.constant 0 : index
    %c0_2 = arith.constant 0 : index
    %1 = vector.load %arg2[%c0_1, %c0_2] : memref<1x512xf32, #tpu.memory_space<vmem>>, vector<1x512xf32>
    %2 = arith.mulf %0, %1 : vector<1x512xf32>
    %c0_3 = arith.constant 0 : index
    %c0_4 = arith.constant 0 : index
    %3 = vector.load %arg3[%c0_3, %c0_4] : memref<1x512xf32, #tpu.memory_space<vmem>>, vector<1x512xf32>
    %4 = arith.addf %2, %3 : vector<1x512xf32>
    %c0_5 = arith.constant 0 : index
    %c0_6 = arith.constant 0 : index
    %5 = vector.load %arg4[%c0_5, %c0_6] : memref<1x512xf32, #tpu.memory_space<vmem>>, vector<1x512xf32>
    tpu.vector_store %arg4[%c0_5, %c0_6], %4 {strides = array<i32>} : memref<1x512xf32, #tpu.memory_space<vmem>>, vector<1x512xf32>,
    return
  }
  func.func @transform_0(%arg0: i32) -> (i32, i32) {
    %c0_i32 = arith.constant 0 : i32
    %c0_i32_0 = arith.constant 0 : i32
    return %arg0, %c0_i32 : i32, i32
  }
  func.func @transform_1(%arg0: i32) -> (i32, i32) {
    %c0_i32 = arith.constant 0 : i32
    %c0_i32_0 = arith.constant 0 : i32
    %c0_i32_1 = arith.constant 0 : i32
    return %c0_i32, %c0_i32_0 : i32, i32
  }
  func.func @transform_2(%arg0: i32) -> (i32, i32) {
    %c0_i32 = arith.constant 0 : i32
    %c0_i32_0 = arith.constant 0 : i32
    %c0_i32_1 = arith.constant 0 : i32
    return %c0_i32, %c0_i32_0 : i32, i32
  }
  func.func @transform_3(%arg0: i32) -> (i32, i32) {
    %c0_i32 = arith.constant 0 : i32
    %c0_i32_0 = arith.constant 0 : i32
    return %arg0, %c0_i32 : i32, i32
  }
}

</mosaic_0001>

<bundles_post_ra>
// kernel: tpu_custom_call.1
= control target key start
LH: loop header
LB: loop body
LE: loop exit
PB: predicated region body
PF: predicated region fallthrough
CT: control target
= control target key end

     0   :  { %8 = vsyncpa [#allocation3], 0  ;;  %s202_s0 = inlined_call_operand.hbm [shape: f32[1,512], index: 0, kind: input, shape index: {}]   ;;  %s203_s1 = inlined_call_operand.hbm [shape: f32[1,512], index: 1, kind: input, shape index: {}]   ;;  %s204_s2 = inlined_call_operand.hbm [shape: f32[1,512], index: 2, kind: input, shape index: {}]   ;;  %s205_s3 = inlined_call_operand.hbm [shape: f32[1,512], index: 3, kind: output, shape index: {}]  }
   0x1   :  { %9 = vsyncpa [#allocation6], 0 }
   0x2   :  { %10 = vsyncpa [#allocation4], 0  ;;  %s166_s12 = smov [#allocation5]   ;;  %s167_s14 = smov [#allocation2]  }
   0x3   :  { %s27_s13 = sshll.u32 %s166_s12, 4  ;;  %s17_s15 = sshll.u32 %s167_s14, 4  ;;  %s28_s13 = int_to_ptr.vmem [resolvable:$true] %s27_s13  ;;  %s18_s15 = int_to_ptr.vmem [resolvable:$true] %s17_s15 }
   0x4   :  { %s88_s16 = scalar_lea.vmem %s28_s13, 64  ;;  %p93_p1 = scmp.lt.s32.totalorder %s28_s13, %s28_s13 }
   0x5   :  { %p89_p0 = scmp.ne.s32.totalorder %s28_s13, %s88_s16  ;;  %p94_p2 = scmp.lt.s32.totalorder %s88_s16, %s88_s16 }
   0x7   :  { %p95_p3 = por %p94_p2, %p93_p1 }
   0x9   :  { %p96_p4 = pnand %p95_p3, %p89_p0 }
   0xb   :  { %99 = shalt.err (!%p96_p4)
}
   0xc   :  { %30 = dma.hbm_to_vmem [thread:$0]  %s203_s1, 64, %s28_s13, [#allocation6]  }
   0xd   :  { %s108_s19 = scalar_lea.vmem %s18_s15, 64  ;;  %p113_p6 = scmp.lt.s32.totalorder %s18_s15, %s18_s15 }
   0xe   :  { %p109_p5 = scmp.ne.s32.totalorder %s18_s15, %s108_s19  ;;  %p114_p7 = scmp.lt.s32.totalorder %s108_s19, %s108_s19 }
  0x10   :  { %p115_p8 = por %p114_p7, %p113_p6 }
  0x12   :  { %p116_p9 = pnand %p115_p8, %p109_p5 }
  0x14   :  { %119 = shalt.err (!%p116_p9)
}
  0x15   :  { %20 = dma.hbm_to_vmem [thread:$0]  %s202_s0, 64, %s18_s15, [#allocation3]  }
  0x16   :  { %s168_s22 = smov [#allocation7]  }
  0x17   :  { %s37_s23 = sshll.u32 %s168_s22, 4  ;;  %s38_s23 = int_to_ptr.vmem [resolvable:$true] %s37_s23 }
  0x18   :  { %s128_s24 = scalar_lea.vmem %s38_s23, 64  ;;  %p133_p11 = scmp.lt.s32.totalorder %s38_s23, %s38_s23 }
  0x19   :  { %p129_p10 = scmp.ne.s32.totalorder %s38_s23, %s128_s24  ;;  %p134_p12 = scmp.lt.s32.totalorder %s128_s24, %s128_s24 }
  0x1b   :  { %p135_p13 = por %p134_p12, %p133_p11 }
  0x1d   :  { %p136_p0 = pnand %p135_p13, %p129_p10 }
  0x1f   :  { %139 = shalt.err (!%p136_p0)
}
  0x20   :  { %40 = dma.hbm_to_vmem [thread:$0]  %s204_s2, 64, %s38_s23, [#allocation6]  }
  0x21   :  { %160 = dma.done.wait [#allocation3], 64  }
  0x22   :  { %161 = vsyncadd [#allocation3], 4294967232 }
  0x23   :  { %162 = dma.done.wait [#allocation6], 128  }
  0x24   :  { %163 = vsyncadd [#allocation6], 4294967168  ;;  %v55_v0 = vlaneseq  ;;  %s169_s0 = smov [#allocation8]   ;;  %v50_v1 = vld [vmem:[#allocation2] sm:$0xf] }
  0x25   :  { %s66_s26 = sshll.u32 %s169_s0, 4  ;;  %v51_v2 = vld [vmem:[#allocation5] sm:$0xf]  ;;  %v53_v3 = vld [vmem:[#allocation7] sm:$0xf]  ;;  %s67_s26 = int_to_ptr.vmem [resolvable:$true] %s66_s26 }
  0x26   :  { %v52_v4 = vmul.f32 %v51_v2, %v50_v1  ;;  %vm57_vm0 = vcmp.lt.s32.totalorder %v55_v0, 512  ;;  %s140_s27 = scalar_lea.vmem %s67_s26, 64  ;;  %p145_p2 = scmp.lt.s32.totalorder %s67_s26, %s67_s26 }
  0x27   :  { %p141_p1 = scmp.ne.s32.totalorder %s67_s26, %s140_s27  ;;  %p146_p3 = scmp.lt.s32.totalorder %s140_s27, %s140_s27 }
  0x28   :  { %v54_v5 = vadd.f32 %v53_v3, %v52_v4 }
  0x29   :  { %p147_p4 = por %p146_p3, %p145_p2 }
  0x2a   :  { %59 = vst.msk [vmem:[#allocation8] sm:$0xf] %vm57_vm0, %v54_v5 }
  0x2b   :  { %p148_p5 = pnand %p147_p4, %p141_p1 }
  0x2d   :  { %151 = shalt.err (!%p148_p5)
}
  0x2e   :  { %69 = dma.vmem_to_hbm [thread:$0]  %s67_s26, 64, %s205_s3, [#allocation4]  }
  0x2f   :  { %164 = dma.done.wait [#allocation4], 64  }
  0x30   :  { %165 = vsyncadd [#allocation4], 4294967232 }
  0x31   :  { %73 = vsyncpa [#allocation3], 1 }
  0x32   :  { %74 = vsyncpa [#allocation6], 1 }
  0x33   :  { %75 = vsyncpa [#allocation4], 1 }

</bundles_post_ra>
